<compile_context>
chip_gen: v5e
topology: v5e:2x2
jax: 0.10.0
libtpu: 0.0.40
codegen_flags: <defaults>
</compile_context>

<pallas_src>
import jax
import jax.numpy as jnp
from jax.experimental import pallas as pl
from jax.experimental.pallas import tpu as pltpu

_LANE = 128      # lane width (last dim)
_SUBLANE = 8     # sublane width (second-to-last dim)
_VMEM_BUDGET_BYTES = 48 * 1024 * 1024   # conservative: fits v7x (64 MiB physical)


def _round_up(n, m):
    return ((n + m - 1) // m) * m


def critic_kernel(x_ref, w1_ref, b1_ref, w2_ref, b2_ref, o_ref):
    # x: [TB, Ip], w1: [Ip, Hp], b1: [1, Hp], w2: [Hp, Op], b2: [1, Op], o: [TB, Op]
    x = x_ref[...]
    h = jnp.dot(x, w1_ref[...], preferred_element_type=jnp.float32)
    h = h + b1_ref[...].astype(jnp.float32)
    h = jnp.maximum(h, 0.0)                                      # ReLU (f32 VPU)
    y = jnp.dot(h.astype(w2_ref.dtype), w2_ref[...],
                preferred_element_type=jnp.float32)
    y = y + b2_ref[...].astype(jnp.float32)
    o_ref[...] = y.astype(o_ref.dtype)


def pad_critic_params(w1, b1, w2, b2, *, compute_dtype=None):
    """Pad params to lane-dense shapes ONCE (hoisted out of the forward path).

    Zero padding is numerically exact: padded input features hit zero weight
    rows; padded hidden units have zero weight+bias so ReLU(0)=0 feeds zero
    w2 rows; padded output columns are sliced off in the forward.
    Returns ((w1p, b1p, w2p, b2p), (I, H, O)).
    """
    I, H = w1.shape
    O = w2.shape[1]
    Ip, Hp, Op = _round_up(I, _LANE), _round_up(H, _LANE), _round_up(O, _LANE)
    wdt = w1.dtype if compute_dtype is None else jnp.dtype(compute_dtype)
    w1p = jnp.zeros((Ip, Hp), wdt).at[:I, :H].set(w1.astype(wdt))
    b1p = jnp.zeros((1, Hp), wdt).at[0, :H].set(b1.astype(wdt))
    w2p = jnp.zeros((Hp, Op), wdt).at[:H, :O].set(w2.astype(wdt))
    b2p = jnp.zeros((1, Op), wdt).at[0, :O].set(b2.astype(wdt))
    return (w1p, b1p, w2p, b2p), (I, H, O)


def _resident_vmem_bytes(tb, Ip, Hp, Op, act_itemsize, w_itemsize):
    # Double-buffered activation/output tiles + single-buffered resident weights.
    act = 2 * tb * (Ip + Op) * act_itemsize
    wts = (Ip * Hp + Hp * Op + Hp + Op) * w_itemsize
    return act + wts


def _pick_batch_tile(B, block_b, min_steps, Ip, Hp, Op, act_itemsize, w_itemsize):
    """Choose TB: multiple of 8, <= block_b, small padding waste, >= min_steps
    grid steps when B permits (v7x megacore), and within the VMEM budget."""
    b_pad8 = _round_up(B, _SUBLANE)
    tb_cap = max(_SUBLANE, min(_round_up(block_b, _SUBLANE), b_pad8))
    n = pl.cdiv(b_pad8, tb_cap)
    if n < min_steps and b_pad8 >= min_steps * _SUBLANE:
        n = min_steps
    tb = min(tb_cap, _round_up(pl.cdiv(B, n), _SUBLANE))
    # Shrink until the resident footprint fits the cross-generation budget.
    while tb > _SUBLANE and (
            _resident_vmem_bytes(tb, Ip, Hp, Op, act_itemsize, w_itemsize) * 1.2
            > _VMEM_BUDGET_BYTES):
        tb = max(_SUBLANE, _round_up(tb // 2, _SUBLANE))
    n_blocks = pl.cdiv(B, tb)
    return tb, n_blocks, tb * n_blocks


def critic_net_forward(x, padded_params, dims, *, block_b=512, min_steps=2):
    """x: [B, I]; padded_params from pad_critic_params; dims = (I, H, O) -> [B, O]."""
    w1p, b1p, w2p, b2p = padded_params
    I, H, O = dims
    B = x.shape[0]
    assert x.shape[1] == I, f"expected x[:, {I}], got {x.shape}"
    Ip, Hp = w1p.shape
    Op = w2p.shape[1]

    compute_dtype = w1p.dtype          # MXU feed dtype (f32 or bf16)
    out_dtype = x.dtype                # keep the caller's dtype for the output
    act_itemsize = jnp.dtype(compute_dtype).itemsize
    w_itemsize = jnp.dtype(w1p.dtype).itemsize

    tb, n_blocks, b_padded = _pick_batch_tile(
        B, block_b, min_steps, Ip, Hp, Op, act_itemsize, w_itemsize)

    # Batch + lane padding of activations (cast to compute dtype in the same op).
    xp = jnp.zeros((b_padded, Ip), compute_dtype).at[:B, :I].set(x.astype(compute_dtype))

    vmem_est = _resident_vmem_bytes(tb, Ip, Hp, Op, act_itemsize, w_itemsize)
    vmem_limit = min(128 * 1024 * 1024, int(vmem_est * 1.25) + (1 << 20))

    # Realistic cost estimate from the TRUE dims / bytes, not the padded ones.
    flops = 2 * B * (I * H + H * O)
    bytes_accessed = (
        B * I * act_itemsize
        + (I * H + H + H * O + O) * w_itemsize
        + B * O * jnp.dtype(out_dtype).itemsize
    )

    out_padded = pl.pallas_call(
        critic_kernel,
        out_shape=jax.ShapeDtypeStruct((b_padded, Op), out_dtype),
        grid=(n_blocks,),
        in_specs=[
            # Activations: batch-tiled, default double-buffering for overlap.
            pl.BlockSpec((tb, Ip), lambda i: (i, 0)),
            # Weights/biases: constant index_map (VMEM-resident), single-buffered.
            pl.BlockSpec((Ip, Hp), lambda i: (0, 0), pipeline_mode=pl.Buffered(1)),
            pl.BlockSpec((1, Hp), lambda i: (0, 0), pipeline_mode=pl.Buffered(1)),
            pl.BlockSpec((Hp, Op), lambda i: (0, 0), pipeline_mode=pl.Buffered(1)),
            pl.BlockSpec((1, Op), lambda i: (0, 0), pipeline_mode=pl.Buffered(1)),
        ],
        out_specs=pl.BlockSpec((tb, Op), lambda i: (i, 0)),
        compiler_params=pltpu.CompilerParams(
            dimension_semantics=("parallel",),
            vmem_limit_bytes=vmem_limit,
        ),
        cost_estimate=pl.CostEstimate(
            flops=flops, transcendentals=0, bytes_accessed=bytes_accessed),
    )(xp, w1p, b1p, w2p, b2p)

    # Slice away batch/output padding outside the kernel.
    return out_padded[:B, :O]


def critic_net_apply(x, w1, b1, w2, b2, *, compute_dtype=None, block_b=512, min_steps=2):
    """Convenience one-shot path (pads params inline; prefer pad_critic_params
    + critic_net_forward when calling repeatedly)."""
    padded, dims = pad_critic_params(w1, b1, w2, b2, compute_dtype=compute_dtype)
    return critic_net_forward(x, padded, dims, block_b=block_b, min_steps=min_steps)


def init_critic_params(key, input_size, hidden_size, output_size, dtype=jnp.float32):
    """Deterministic init mimicking nn.Linear's U(-1/sqrt(fan_in), 1/sqrt(fan_in))."""
    k1, k2, k3, k4 = jax.random.split(key, 4)
    bound1 = 1.0 / (input_size ** 0.5)
    bound2 = 1.0 / (hidden_size ** 0.5)
    # Stored as [in, out] (transpose of PyTorch's [out, in]).
    w1 = jax.random.uniform(k1, (input_size, hidden_size), dtype, -bound1, bound1)
    b1 = jax.random.uniform(k2, (hidden_size,), dtype, -bound1, bound1)
    w2 = jax.random.uniform(k3, (hidden_size, output_size), dtype, -bound2, bound2)
    b2 = jax.random.uniform(k4, (output_size,), dtype, -bound2, bound2)
    return w1, b1, w2, b2


if __name__ == "__main__":
    # Small shapes consistent with the module: batch=8, input=32, hidden=32, output=4.
    batch, input_size, hidden_size, output_size = 8, 32, 32, 4

    key = jax.random.PRNGKey(0)
    kx, kp = jax.random.split(key)
    x = jax.random.normal(kx, (batch, input_size), jnp.float32)
    w1, b1, w2, b2 = init_critic_params(kp, input_size, hidden_size, output_size)

    # Pad the weights ONCE (hoisted out of the per-forward hot path).
    padded_f32, dims = pad_critic_params(w1, b1, w2, b2)

    out = critic_net_forward(x, padded_f32, dims)
    out = jax.block_until_ready(out)

    # Reference check against plain JAX (same semantics as the PyTorch forward).
    ref = jnp.maximum(x @ w1 + b1, 0.0) @ w2 + b2
    assert out.shape == (batch, output_size)
    assert jnp.allclose(out, ref, atol=1e-5, rtol=1e-5)

    # Larger, multi-step batch to exercise the batch grid (2 balanced steps of 152).
    big_b = 300
    xb = jax.random.normal(jax.random.PRNGKey(1), (big_b, input_size), jnp.float32)
    out_b = jax.block_until_ready(critic_net_forward(xb, padded_f32, dims))
    ref_b = jnp.maximum(xb @ w1 + b1, 0.0) @ w2 + b2
    assert out_b.shape == (big_b, output_size)
    assert jnp.allclose(out_b, ref_b, atol=1e-4, rtol=1e-4)

    # Optional bf16 compute path (v6e/v7x MXU-friendly); relaxed tolerance.
    padded_bf16, dims_bf16 = pad_critic_params(w1, b1, w2, b2, compute_dtype=jnp.bfloat16)
    out_bf16 = jax.block_until_ready(critic_net_forward(xb, padded_bf16, dims_bf16))
    assert out_bf16.shape == (big_b, output_size)
    assert jnp.allclose(out_bf16, ref_b, atol=5e-2, rtol=5e-2)

    print("KERNEL_OK")
</pallas_src>

<mosaic_0001>
module attributes {stable_mosaic.version = 11 : i64} {
  func.func @critic_kernel(%arg0: i32, %arg1: memref<8x128xf32, #tpu.memory_space<vmem>>, %arg2: memref<128x128xf32, #tpu.memory_space<vmem>>, %arg3: memref<1x128xf32, #tpu.memory_space<vmem>>, %arg4: memref<128x128xf32, #tpu.memory_space<vmem>>, %arg5: memref<1x128xf32, #tpu.memory_space<vmem>>, %arg6: memref<8x128xf32, #tpu.memory_space<vmem>>) attributes {dimension_semantics = [#tpu.dimension_semantics<parallel>], iteration_bounds = array<i64: 1>, scalar_prefetch = 0 : i64, scratch_operands = 0 : i64, tpu.core_type = #tpu.core_type<tc>, window_params = [{transform_indices = @transform_0, window_bounds = array<i64: 8, 128>}, {pipeline_mode = #tpu.pipeline_mode<synchronous>, transform_indices = @transform_1, window_bounds = array<i64: 128, 128>}, {pipeline_mode = #tpu.pipeline_mode<synchronous>, transform_indices = @transform_2, window_bounds = array<i64: 1, 128>}, {pipeline_mode = #tpu.pipeline_mode<synchronous>, transform_indices = @transform_3, window_bounds = array<i64: 128, 128>}, {pipeline_mode = #tpu.pipeline_mode<synchronous>, transform_indices = @transform_4, window_bounds = array<i64: 1, 128>}, {transform_indices = @transform_5, window_bounds = array<i64: 8, 128>}]} {
    %c0 = arith.constant 0 : index
    %c0_0 = arith.constant 0 : index
    %0 = vector.load %arg1[%c0, %c0_0] : memref<8x128xf32, #tpu.memory_space<vmem>>, vector<8x128xf32>
    %c0_1 = arith.constant 0 : index
    %c0_2 = arith.constant 0 : index
    %1 = vector.load %arg2[%c0_1, %c0_2] : memref<128x128xf32, #tpu.memory_space<vmem>>, vector<128x128xf32>
    %cst = arith.constant dense<0.000000e+00> : vector<8x128xf32>
    %2 = tpu.matmul %0, %1, %cst {dimension_numbers = #tpu.dot_dimension_numbers<[1], [0], [0], [1], [0, 0, 1, 1], [], []>} : vector<8x128xf32>, vector<128x128xf32>, vector<8x128xf32> -> vector<8x128xf32>
    %c0_3 = arith.constant 0 : index
    %c0_4 = arith.constant 0 : index
    %3 = vector.load %arg3[%c0_3, %c0_4] : memref<1x128xf32, #tpu.memory_space<vmem>>, vector<1x128xf32>
    %4 = vector.broadcast %3 : vector<1x128xf32> to vector<8x128xf32>
    %5 = arith.addf %2, %4 : vector<8x128xf32>
    %cst_5 = arith.constant 0.000000e+00 : f32
    %6 = vector.broadcast %cst_5 : f32 to vector<8x128xf32>
    %7 = arith.maximumf %5, %6 : vector<8x128xf32>
    %c0_6 = arith.constant 0 : index
    %c0_7 = arith.constant 0 : index
    %8 = vector.load %arg4[%c0_6, %c0_7] : memref<128x128xf32, #tpu.memory_space<vmem>>, vector<128x128xf32>
    %cst_8 = arith.constant dense<0.000000e+00> : vector<8x128xf32>
    %9 = tpu.matmul %7, %8, %cst_8 {dimension_numbers = #tpu.dot_dimension_numbers<[1], [0], [0], [1], [0, 0, 1, 1], [], []>} : vector<8x128xf32>, vector<128x128xf32>, vector<8x128xf32> -> vector<8x128xf32>
    %c0_9 = arith.constant 0 : index
    %c0_10 = arith.constant 0 : index
    %10 = vector.load %arg5[%c0_9, %c0_10] : memref<1x128xf32, #tpu.memory_space<vmem>>, vector<1x128xf32>
    %11 = vector.broadcast %10 : vector<1x128xf32> to vector<8x128xf32>
    %12 = arith.addf %9, %11 : vector<8x128xf32>
    %c0_11 = arith.constant 0 : index
    %c0_12 = arith.constant 0 : index
    %13 = vector.load %arg6[%c0_11, %c0_12] : memref<8x128xf32, #tpu.memory_space<vmem>>, vector<8x128xf32>
    tpu.vector_store %arg6[%c0_11, %c0_12], %12 {strides = array<i32>} : memref<8x128xf32, #tpu.memory_space<vmem>>, vector<8x128xf32>,
    return
  }
  func.func @transform_0(%arg0: i32) -> (i32, i32) {
    %c0_i32 = arith.constant 0 : i32
    %c0_i32_0 = arith.constant 0 : i32
    return %arg0, %c0_i32 : i32, i32
  }
  func.func @transform_1(%arg0: i32) -> (i32, i32) {
    %c0_i32 = arith.constant 0 : i32
    %c0_i32_0 = arith.constant 0 : i32
    %c0_i32_1 = arith.constant 0 : i32
    return %c0_i32, %c0_i32_0 : i32, i32
  }
  func.func @transform_2(%arg0: i32) -> (i32, i32) {
    %c0_i32 = arith.constant 0 : i32
    %c0_i32_0 = arith.constant 0 : i32
    %c0_i32_1 = arith.constant 0 : i32
    return %c0_i32, %c0_i32_0 : i32, i32
  }
  func.func @transform_3(%arg0: i32) -> (i32, i32) {
    %c0_i32 = arith.constant 0 : i32
    %c0_i32_0 = arith.constant 0 : i32
    %c0_i32_1 = arith.constant 0 : i32
    return %c0_i32, %c0_i32_0 : i32, i32
  }
  func.func @transform_4(%arg0: i32) -> (i32, i32) {
    %c0_i32 = arith.constant 0 : i32
    %c0_i32_0 = arith.constant 0 : i32
    %c0_i32_1 = arith.constant 0 : i32
    return %c0_i32, %c0_i32_0 : i32, i32
  }
  func.func @transform_5(%arg0: i32) -> (i32, i32) {
    %c0_i32 = arith.constant 0 : i32
    %c0_i32_0 = arith.constant 0 : i32
    return %arg0, %c0_i32 : i32, i32
  }
}

</mosaic_0001>

<bundles_post_ra>
// kernel: tpu_custom_call.1
= control target key start
LH: loop header
LB: loop body
LE: loop exit
PB: predicated region body
PF: predicated region fallthrough
CT: control target
= control target key end

     0   :  { %10 = vsyncpa [#allocation3], 0  ;;  %s331_s0 = inlined_call_operand.hbm [shape: f32[8,128], index: 0, kind: input, shape index: {}]   ;;  %s332_s1 = inlined_call_operand.hbm [shape: f32[128,128], index: 1, kind: input, shape index: {}]   ;;  %s333_s2 = inlined_call_operand.vmem [shape: f32[1,128], index: 2, kind: input, shape index: {}]   ;;  %s334_s3 = inlined_call_operand.hbm [shape: f32[128,128], index: 3, kind: input, shape index: {}]   ;;  %s335_s4 = inlined_call_operand.vmem [shape: f32[1,128], index: 4, kind: input, shape index: {}]   ;;  %s336_s5 = inlined_call_operand.hbm [shape: f32[8,128], index: 5, kind: output, shape index: {}]  }
   0x1   :  { %11 = vsyncpa [#allocation6], 0  ;;  %s28_s20 = sshll.u32 %s332_s1, 4  ;;  %s29_s20 = int_to_ptr.hbm [resolvable:$true] %s28_s20 }
   0x2   :  { %12 = vsyncpa [#allocation4], 0  ;;  %s277_s21 = smov [#allocation5]   ;;  %s18_s25 = sshll.u32 %s331_s0, 4  ;;  %s19_s25 = int_to_ptr.hbm [resolvable:$true] %s18_s25 }
   0x3   :  { %s30_s22 = sshll.u32 %s277_s21, 4  ;;  %s278_s26 = smov 128   ;;  %s31_s22 = int_to_ptr.vmem [resolvable:$true] %s30_s22 }
   0x4   :  { %s279_s27 = smov 8   ;;  %s280_s28 = smov [#allocation2]  }
   0x5   :  { %36 = dma.hbm_to_vmem [thread:$0]  %s29_s20, 2048, %s31_s22, [#allocation6], %s278_s26, %s278_s26, %s279_s27  }
   0x6   :  { %s20_s29 = sshll.u32 %s280_s28, 4  ;;  %s43_s7 = sshll.u32 %s334_s3, 4  ;;  %s21_s29 = int_to_ptr.vmem [resolvable:$true] %s20_s29  ;;  %s44_s7 = int_to_ptr.hbm [resolvable:$true] %s43_s7 }
   0x7   :  { %23 = dma.hbm_to_vmem [thread:$0]  %s19_s25, 128, %s21_s29, [#allocation3]  }
   0x8   :  { %s281_s1 = smov [#allocation7]  }
   0x9   :  { %s45_s8 = sshll.u32 %s281_s1, 4  ;;  %s46_s8 = int_to_ptr.vmem [resolvable:$true] %s45_s8 }
   0xa   :  { %51 = dma.hbm_to_vmem [thread:$0]  %s44_s7, 2048, %s46_s8, [#allocation6], %s278_s26, %s278_s26, %s279_s27  }
   0xb   :  { %271 = dma.done.wait [#allocation3], 128  }
   0xc   :  { %272 = vsyncadd [#allocation3], 4294967168 }
   0xd   :  { %273 = dma.done.wait [#allocation6], 4096  }
   0xe   :  { %274 = vsyncadd [#allocation6], 4294963200  ;;  %v82_v0 = vld [vmem:[#allocation5 + $0x78] sm:$0xff]  ;;  %v81_v1 = vld [vmem:[#allocation5 + $0x70] sm:$0xff]  ;;  %s282_s11 = smov [#allocation8]   ;;  %s156_s15 = sshll.u32 %s336_s5, 4  ;;  %s157_s15 = int_to_ptr.hbm [resolvable:$true] %s156_s15 }
   0xf   :  { %87 = vmatpush.msra.mxu0 %v82_v0  ;;  %v80_v2 = vld [vmem:[#allocation5 + $0x68] sm:$0xff]  ;;  %v79_v3 = vld [vmem:[#allocation5 + $0x60] sm:$0xff]  ;;  %v123_v4 = vld [vmem:[#allocation7 + $0x78] sm:$0xff]  ;;  %s154_s12 = sshll.u32 %s282_s11, 4  ;;  %s155_s12 = int_to_ptr.vmem [resolvable:$true] %s154_s12 }
  0x10   :  { %v78_v5 = vld [vmem:[#allocation5 + $0x58] sm:$0xff]  ;;  %128 = vmatpush.msra.mxu1 %v123_v4  ;;  %v122_v6 = vld [vmem:[#allocation7 + $0x70] sm:$0xff]  ;;  %v121_v7 = vld [vmem:[#allocation7 + $0x68] sm:$0xff] }
  0x11   :  { %88 = vmatpush.msra.mxu0 %v81_v1  ;;  %v77_v8 = vld [vmem:[#allocation5 + $0x50] sm:$0xff]  ;;  %v120_v9 = vld [vmem:[#allocation7 + $0x60] sm:$0xff]  ;;  %v76_v10 = vld [vmem:[#allocation5 + $0x48] sm:$0xff] }
  0x12   :  { %129 = vmatpush.msra.mxu1 %v122_v6  ;;  %v119_v11 = vld [vmem:[#allocation7 + $0x58] sm:$0xff]  ;;  %v75_v12 = vld [vmem:[#allocation5 + $0x40] sm:$0xff]  ;;  %v118_v13 = vld [vmem:[#allocation7 + $0x50] sm:$0xff] }
  0x13   :  { %89 = vmatpush.msra.mxu0 %v80_v2  ;;  %v74_v14 = vld [vmem:[#allocation5 + $0x38] sm:$0xff]  ;;  %v117_v15 = vld [vmem:[#allocation7 + $0x48] sm:$0xff]  ;;  %v73_v16 = vld [vmem:[#allocation5 + $0x30] sm:$0xff] }
  0x14   :  { %130 = vmatpush.msra.mxu1 %v121_v7  ;;  %v116_v17 = vld [vmem:[#allocation7 + $0x40] sm:$0xff]  ;;  %v72_v18 = vld [vmem:[#allocation5 + $0x28] sm:$0xff]  ;;  %v115_v19 = vld [vmem:[#allocation7 + $0x38] sm:$0xff] }
  0x15   :  { %90 = vmatpush.msra.mxu0 %v79_v3  ;;  %v71_v20 = vld [vmem:[#allocation5 + $0x20] sm:$0xff]  ;;  %v114_v21 = vld [vmem:[#allocation7 + $0x30] sm:$0xff]  ;;  %v70_v22 = vld [vmem:[#allocation5 + $0x18] sm:$0xff] }
  0x16   :  { %131 = vmatpush.msra.mxu1 %v120_v9  ;;  %v113_v23 = vld [vmem:[#allocation7 + $0x28] sm:$0xff]  ;;  %v69_v24 = vld [vmem:[#allocation5 + $0x10] sm:$0xff]  ;;  %v112_v25 = vld [vmem:[#allocation7 + $0x20] sm:$0xff] }
  0x17   :  { %91 = vmatpush.msra.mxu0 %v78_v5  ;;  %v68_v26 = vld [vmem:[#allocation5 + $0x8] sm:$0xff]  ;;  %v111_v27 = vld [vmem:[#allocation7 + $0x18] sm:$0xff]  ;;  %v67_v28 = vld [vmem:[#allocation5] sm:$0xff] }
  0x18   :  { %132 = vmatpush.msra.mxu1 %v119_v11  ;;  %v66_v29 = vld [vmem:[#allocation2] sm:$0xff]  ;;  %v110_v30 = vld [vmem:[#allocation7 + $0x10] sm:$0xff]  ;;  %v109_v31 = vld [vmem:[#allocation7 + $0x8] sm:$0xff] }
  0x19   :  { %92 = vmatpush.msra.mxu0 %v77_v8  ;;  %v108_v32 = vld [vmem:[#allocation7] sm:$0xff]  ;;  %v173_v33 = vld [vmem:[%s333_s2] ss:$0 sm:$0xff] }
  0x1a   :  { %133 = vmatpush.msra.mxu1 %v118_v13  ;;  %v174_v37 = vld [vmem:[%s335_s4] ss:$0 sm:$0xff] }
  0x1b   :  { %93 = vmatpush.msra.mxu0 %v76_v10 }
  0x1c   :  { %134 = vmatpush.msra.mxu1 %v117_v15 }
  0x1d   :  { %94 = vmatpush.msra.mxu0 %v75_v12 }
  0x1e   :  { %135 = vmatpush.msra.mxu1 %v116_v17 }
  0x1f   :  { %95 = vmatpush.msra.mxu0 %v74_v14 }
  0x20   :  { %136 = vmatpush.msra.mxu1 %v115_v19 }
  0x21   :  { %96 = vmatpush.msra.mxu0 %v73_v16 }
  0x22   :  { %137 = vmatpush.msra.mxu1 %v114_v21 }
  0x23   :  { %97 = vmatpush.msra.mxu0 %v72_v18 }
  0x24   :  { %138 = vmatpush.msra.mxu1 %v113_v23 }
  0x25   :  { %98 = vmatpush.msra.mxu0 %v71_v20 }
  0x26   :  { %139 = vmatpush.msra.mxu1 %v112_v25 }
  0x27   :  { %99 = vmatpush.msra.mxu0 %v70_v22 }
  0x28   :  { %140 = vmatpush.msra.mxu1 %v111_v27 }
  0x29   :  { %100 = vmatpush.msra.mxu0 %v69_v24 }
  0x2a   :  { %141 = vmatpush.msra.mxu1 %v110_v30 }
  0x2b   :  { %101 = vmatpush.msra.mxu0 %v68_v26 }
  0x2c   :  { %142 = vmatpush.msra.mxu1 %v109_v31 }
  0x2d   :  { %102 = vmatpush.msra.mxu0 %v67_v28 }
  0x2e   :  { %103 = vmatmul.f32.vlgmr.msra.gmra.mxu0 %v66_v29  ;;  %143 = vmatpush.msra.mxu1 %v108_v32 }
  0xab   :  { %v104_v34 = vpop.f32.mrf.mxu0 }
  0xac   :  { %v105_v35 = vadd.f32 %v173_v33, %v104_v34 }
  0xae   :  { %v107_v36 = vmax.f32 %v105_v35, 0.0 }
  0xb0   :  { %144 = vmatmul.f32.vlgmr.msra.gmra.mxu1 %v107_v36 }
 0x12d   :  { %v145_v38 = vpop.f32.mrf.mxu1 }
 0x12e   :  { %v146_v39 = vadd.f32 %v174_v37, %v145_v38 }
 0x130   :  { %148 = vst [vmem:[#allocation8] sm:$0xff] %v146_v39 }
 0x131   :  { %159 = dma.vmem_to_hbm [thread:$0]  %s155_s12, 128, %s157_s15, [#allocation4]  }
 0x132   :  { %275 = dma.done.wait [#allocation4], 128  }
 0x133   :  { %276 = vsyncadd [#allocation4], 4294967168 }
 0x134   :  { %164 = vsyncpa [#allocation3], 1 }
 0x135   :  { %165 = vsyncpa [#allocation6], 1 }
 0x136   :  { %166 = vsyncpa [#allocation4], 1 }

</bundles_post_ra>
